<compile_context>
chip_gen: v5e
topology: v5e:2x2
jax: 0.10.0
libtpu: 0.0.40
codegen_flags: <defaults>
</compile_context>

<pallas_src>
import functools

import jax
import jax.numpy as jnp
from jax.experimental import pallas as pl
from jax.experimental.pallas import tpu as pltpu

KERNEL_SIZES = (3, 4, 5)
KMAX = max(KERNEL_SIZES)
LANE = 128
SUBLANE = 8


def _cnn_text_kernel(x_ref, w_ref, mb_ref, wfc_ref, bfc_ref, out_ref, slab_ref):
    """Fused forward for one batch block.

    x_ref    : (M, E)          bf16, M = batch_block * S_pad flattened (batch, time) rows
    w_ref    : (KMAX*E, Npad)  bf16, per-tap conv weights, branches packed on lanes
    mb_ref   : (S_pad, Npad)   f32, conv bias folded with additive validity mask
                               (bias where t is valid for that branch, -1e30 otherwise)
    wfc_ref  : (1, Npad)       f32, final linear weight row (zero in padded lanes)
    bfc_ref  : (1, 1)          f32, final linear bias
    out_ref  : (1, bb)         f32, lane-dense per-block outputs
    slab_ref : (M, KMAX*E)     bf16 VMEM scratch: shifted-window slab
    """
    m, e = x_ref.shape
    s_pad, npad = mb_ref.shape
    bb = out_ref.shape[1]

    # ---- Build the shifted-window slab: slab[r, j*E:(j+1)*E] = x[(r + j) % M].
    # Wrapped / cross-batch rows only land on time steps killed by the -1e30
    # mask below (load-bearing invariant, see file header).
    slab_ref[:, pl.ds(0, e)] = x_ref[...]
    for j in range(1, KMAX):                          # static unroll: 4 narrow copies
        col = pl.ds(j * e, e)
        slab_ref[pl.ds(0, m - j), col] = x_ref[pl.ds(j, m - j), :]
        slab_ref[pl.ds(m - j, j), col] = x_ref[pl.ds(0, j), :]   # finite filler (masked)

    # ---- One K-packed MXU matmul for all 3 conv branches at once: (M, Npad) f32.
    acc = jnp.dot(slab_ref[...], w_ref[...], preferred_element_type=jnp.float32)

    # ---- f32 epilogue: (bias + validity mask) add, ReLU, max over time.
    s = acc.reshape(bb, s_pad, npad) + mb_ref[...]    # S_pad % 8 == 0 -> free reshape
    feat = jnp.max(jnp.maximum(s, 0.0), axis=1)       # (bb, Npad)

    # ---- Final Linear (out_features=1), arranged so the result lands as a
    # lane-dense (1, bb) row: (1, Npad) . (bb, Npad)^T.
    y = jax.lax.dot_general(wfc_ref[...], feat,
                            (((1,), (1,)), ((), ())),
                            preferred_element_type=jnp.float32)   # (1, bb)
    out_ref[...] = (y + bfc_ref[...]).astype(out_ref.dtype)


def _auto_batch_block(batch, s_pad, target_rows):
    """Largest divisor of `batch` with batch_block * S_pad <= target_rows,
    preferring >= 2 grid steps so the ("parallel",) axis can use both v7x TCs."""
    divisors = [d for d in range(1, batch + 1)
                if batch % d == 0 and d * s_pad <= target_rows]
    if not divisors:
        return 1
    multi = [d for d in divisors if batch // d >= 2]
    return max(multi) if multi else max(divisors)


@functools.partial(jax.jit, static_argnames=("batch_block", "target_rows"))
def cnn_base_model_forward(x, params, batch_block=None, target_rows=2048):
    """params: conv_w{k} (O,1,k,E), conv_b{k} (O,), fc_w (1,3O), fc_b (1,)."""
    B, S, E = x.shape
    O = params["conv_w3"].shape[0]
    assert S >= KMAX, "sequence length must cover the widest conv kernel"
    N = len(KERNEL_SIZES) * O
    n_pad = ((N + LANE - 1) // LANE) * LANE               # lane-dense feature width
    s_pad = ((S + SUBLANE - 1) // SUBLANE) * SUBLANE      # sublane-aligned seq length

    if batch_block is None:
        batch_block = _auto_batch_block(B, s_pad, target_rows)
    assert B % batch_block == 0, "batch must divide into batch blocks"
    G = B // batch_block
    M = batch_block * s_pad

    # --- Pack conv weights: row index = tap j * E + embed e, branches on lanes.
    w_pack = jnp.zeros((KMAX * E, n_pad), jnp.float32)
    for i, k in enumerate(KERNEL_SIZES):
        wk = params[f"conv_w{k}"].reshape(O, k, E).astype(jnp.float32)   # (O,k,E)
        wk = jnp.transpose(wk, (1, 2, 0)).reshape(k * E, O)              # (k*E, O)
        w_pack = w_pack.at[: k * E, i * O:(i + 1) * O].set(wk)
    w_pack = w_pack.astype(jnp.bfloat16)

    # --- Conv bias folded with additive validity mask:
    #     branch k has valid windows only at t <= S - k; padded lanes never valid.
    b_col = jnp.zeros((n_pad,), jnp.float32)
    limits = jnp.full((n_pad,), -1, jnp.int32)
    for i, k in enumerate(KERNEL_SIZES):
        b_col = b_col.at[i * O:(i + 1) * O].set(params[f"conv_b{k}"].astype(jnp.float32))
        limits = limits.at[i * O:(i + 1) * O].set(S - k)
    t_idx = jnp.arange(s_pad, dtype=jnp.int32)[:, None]                  # (S_pad, 1)
    mask_bias = jnp.where(t_idx <= limits[None, :], b_col[None, :],
                          -1e30).astype(jnp.float32)                     # (S_pad, Npad)

    wfc = jnp.zeros((1, n_pad), jnp.float32).at[:, :N].set(
        params["fc_w"].reshape(1, N).astype(jnp.float32))
    bfc = params["fc_b"].reshape(1, 1).astype(jnp.float32)

    # --- bf16 input, zero-padded along seq to a sublane multiple.
    x_p = x.astype(jnp.bfloat16)
    if s_pad != S:
        x_p = jnp.pad(x_p, ((0, 0), (0, s_pad - S), (0, 0)))
    x_blk = x_p.reshape(G, M, E)

    out = pl.pallas_call(
        _cnn_text_kernel,
        out_shape=jax.ShapeDtypeStruct((G, 1, batch_block), jnp.float32),
        grid=(G,),
        in_specs=[
            pl.BlockSpec((None, M, E), lambda g: (g, 0, 0)),           # x block
            pl.BlockSpec((KMAX * E, n_pad), lambda g: (0, 0)),         # packed conv W
            pl.BlockSpec((s_pad, n_pad), lambda g: (0, 0)),            # bias + mask
            pl.BlockSpec((1, n_pad), lambda g: (0, 0)),                # fc weight
            pl.BlockSpec((1, 1), lambda g: (0, 0)),                    # fc bias
        ],
        out_specs=pl.BlockSpec((None, 1, batch_block), lambda g: (g, 0, 0)),
        scratch_shapes=[pltpu.VMEM((M, KMAX * E), jnp.bfloat16)],      # window slab
        compiler_params=pltpu.CompilerParams(
            dimension_semantics=("parallel",),     # shards batch blocks across v7x TCs
            vmem_limit_bytes=32 * 1024 * 1024,     # explicit budget; footprint is a few MB
        ),
    )(x_blk, w_pack, mask_bias, wfc, bfc)
    return out.reshape(B, 1)


def init_params(key, o_channels, E):
    """Deterministic init mimicking torch defaults (uniform +/- 1/sqrt(fan_in))."""
    params = {}
    keys = jax.random.split(key, 2 * len(KERNEL_SIZES) + 2)
    for i, k in enumerate(KERNEL_SIZES):
        fan_in = 1 * k * E
        bound = 1.0 / jnp.sqrt(fan_in)
        params[f"conv_w{k}"] = jax.random.uniform(
            keys[2 * i], (o_channels, 1, k, E), jnp.float32, -bound, bound)
        params[f"conv_b{k}"] = jax.random.uniform(
            keys[2 * i + 1], (o_channels,), jnp.float32, -bound, bound)
    fan_in_fc = len(KERNEL_SIZES) * o_channels
    bound = 1.0 / jnp.sqrt(fan_in_fc)
    params["fc_w"] = jax.random.uniform(
        keys[-2], (1, fan_in_fc), jnp.float32, -bound, bound)
    params["fc_b"] = jax.random.uniform(
        keys[-1], (1,), jnp.float32, -bound, bound)
    return params


def _unfold(x, k):
    """(B, S, E) -> (B, S+1-k, k*E) sliding windows (reference only)."""
    B, S, E = x.shape
    T = S + 1 - k
    windows = jnp.stack([x[:, t:t + k, :] for t in range(T)], axis=1)   # (B,T,k,E)
    return windows.reshape(B, T, k * E)


def reference_forward(x, params):
    """Pure-JAX f32 reference of the PyTorch forward (eval mode)."""
    hi = jax.lax.Precision.HIGHEST
    feats = []
    for k in KERNEL_SIZES:
        O = params[f"conv_w{k}"].shape[0]
        xw = _unfold(x, k)                                   # (B, T, k*E)
        w = params[f"conv_w{k}"].reshape(O, -1)              # (O, k*E)
        s = jnp.einsum("btd,od->bto", xw, w, precision=hi) + params[f"conv_b{k}"]
        s = jnp.maximum(s, 0.0)
        feats.append(jnp.max(s, axis=1))                     # (B, O)
    feat = jnp.concatenate(feats, axis=1)
    return jnp.dot(feat, params["fc_w"].T, precision=hi) + params["fc_b"]


if __name__ == "__main__":
    # Shapes consistent with the module: input_shape = (B, S, E)
    B, S, E = 4, 16, 16
    o_channels = 8

    key = jax.random.PRNGKey(0)
    kx, kp = jax.random.split(key)
    x = jax.random.normal(kx, (B, S, E), jnp.float32)
    params = init_params(kp, o_channels, E)

    y = cnn_base_model_forward(x, params)       # auto batch_block (here: 2, G=2)
    y = jax.block_until_ready(y)

    y_ref = reference_forward(x, params)
    assert y.shape == (B, 1), y.shape
    # bf16 MXU inputs vs f32/HIGHEST reference -> relaxed tolerance.
    assert jnp.allclose(y, y_ref, atol=2e-2, rtol=2e-2), (y, y_ref)

    print("KERNEL_OK")
</pallas_src>

<mosaic_0001>
module attributes {stable_mosaic.version = 11 : i64} {
  func.func @_cnn_text_kernel(%arg0: i32, %arg1: memref<1x32x16xbf16, #tpu.memory_space<vmem>>, %arg2: memref<80x128xbf16, #tpu.memory_space<vmem>>, %arg3: memref<16x128xf32, #tpu.memory_space<vmem>>, %arg4: memref<1x128xf32, #tpu.memory_space<vmem>>, %arg5: memref<1x1xf32, #tpu.memory_space<vmem>>, %arg6: memref<1x1x2xf32, #tpu.memory_space<vmem>>, %arg7: memref<32x80xbf16, #tpu.memory_space<vmem>>) attributes {dimension_semantics = [#tpu.dimension_semantics<parallel>], iteration_bounds = array<i64: 2>, scalar_prefetch = 0 : i64, scratch_operands = 1 : i64, tpu.core_type = #tpu.core_type<tc>, window_params = [{transform_indices = @transform_0, window_bounds = array<i64: 1, 32, 16>}, {pipeline_mode = #tpu.pipeline_mode<synchronous>, transform_indices = @transform_1, window_bounds = array<i64: 80, 128>}, {pipeline_mode = #tpu.pipeline_mode<synchronous>, transform_indices = @transform_2, window_bounds = array<i64: 16, 128>}, {pipeline_mode = #tpu.pipeline_mode<synchronous>, transform_indices = @transform_3, window_bounds = array<i64: 1, 128>}, {pipeline_mode = #tpu.pipeline_mode<synchronous>, transform_indices = @transform_4, window_bounds = array<i64: 1, 1>}, {transform_indices = @transform_5, window_bounds = array<i64: 1, 1, 2>}]} {
    %c0 = arith.constant 0 : index
    %c0_0 = arith.constant 0 : index
    %c0_1 = arith.constant 0 : index
    %0 = vector.load %arg1[%c0, %c0_0, %c0_1] : memref<1x32x16xbf16, #tpu.memory_space<vmem>>, vector<1x32x16xbf16>
    %1 = vector.shape_cast %0 : vector<1x32x16xbf16> to vector<32x16xbf16>
    %c0_2 = arith.constant 0 : index
    %c0_3 = arith.constant 0 : index
    %2 = vector.load %arg7[%c0_2, %c0_3] : memref<32x80xbf16, #tpu.memory_space<vmem>>, vector<32x16xbf16>
    tpu.vector_store %arg7[%c0_2, %c0_3], %1 {strides = array<i32>} : memref<32x80xbf16, #tpu.memory_space<vmem>>, vector<32x16xbf16>,
    %c0_4 = arith.constant 0 : index
    %c1 = arith.constant 1 : index
    %c0_5 = arith.constant 0 : index
    %3 = vector.load %arg1[%c0_4, %c1, %c0_5] : memref<1x32x16xbf16, #tpu.memory_space<vmem>>, vector<1x31x16xbf16>
    %4 = vector.shape_cast %3 : vector<1x31x16xbf16> to vector<31x16xbf16>
    %c0_6 = arith.constant 0 : index
    %c16 = arith.constant 16 : index
    %5 = vector.load %arg7[%c0_6, %c16] : memref<32x80xbf16, #tpu.memory_space<vmem>>, vector<31x16xbf16>
    tpu.vector_store %arg7[%c0_6, %c16], %4 {strides = array<i32>} : memref<32x80xbf16, #tpu.memory_space<vmem>>, vector<31x16xbf16>,
    %c0_7 = arith.constant 0 : index
    %c0_8 = arith.constant 0 : index
    %c0_9 = arith.constant 0 : index
    %6 = vector.load %arg1[%c0_7, %c0_8, %c0_9] : memref<1x32x16xbf16, #tpu.memory_space<vmem>>, vector<1x1x16xbf16>
    %7 = vector.shape_cast %6 : vector<1x1x16xbf16> to vector<1x16xbf16>
    %c31 = arith.constant 31 : index
    %c16_10 = arith.constant 16 : index
    %8 = vector.load %arg7[%c31, %c16_10] : memref<32x80xbf16, #tpu.memory_space<vmem>>, vector<1x16xbf16>
    tpu.vector_store %arg7[%c31, %c16_10], %7 {strides = array<i32>} : memref<32x80xbf16, #tpu.memory_space<vmem>>, vector<1x16xbf16>,
    %c0_11 = arith.constant 0 : index
    %c2 = arith.constant 2 : index
    %c0_12 = arith.constant 0 : index
    %9 = vector.load %arg1[%c0_11, %c2, %c0_12] : memref<1x32x16xbf16, #tpu.memory_space<vmem>>, vector<1x30x16xbf16>
    %10 = vector.shape_cast %9 : vector<1x30x16xbf16> to vector<30x16xbf16>
    %c0_13 = arith.constant 0 : index
    %c32 = arith.constant 32 : index
    %11 = vector.load %arg7[%c0_13, %c32] : memref<32x80xbf16, #tpu.memory_space<vmem>>, vector<30x16xbf16>
    tpu.vector_store %arg7[%c0_13, %c32], %10 {strides = array<i32>} : memref<32x80xbf16, #tpu.memory_space<vmem>>, vector<30x16xbf16>,
    %c0_14 = arith.constant 0 : index
    %c0_15 = arith.constant 0 : index
    %c0_16 = arith.constant 0 : index
    %12 = vector.load %arg1[%c0_14, %c0_15, %c0_16] : memref<1x32x16xbf16, #tpu.memory_space<vmem>>, vector<1x2x16xbf16>
    %13 = vector.shape_cast %12 : vector<1x2x16xbf16> to vector<2x16xbf16>
    %c30 = arith.constant 30 : index
    %c32_17 = arith.constant 32 : index
    %14 = vector.load %arg7[%c30, %c32_17] : memref<32x80xbf16, #tpu.memory_space<vmem>>, vector<2x16xbf16>
    tpu.vector_store %arg7[%c30, %c32_17], %13 {strides = array<i32>} : memref<32x80xbf16, #tpu.memory_space<vmem>>, vector<2x16xbf16>,
    %c0_18 = arith.constant 0 : index
    %c3 = arith.constant 3 : index
    %c0_19 = arith.constant 0 : index
    %15 = vector.load %arg1[%c0_18, %c3, %c0_19] : memref<1x32x16xbf16, #tpu.memory_space<vmem>>, vector<1x29x16xbf16>
    %16 = vector.shape_cast %15 : vector<1x29x16xbf16> to vector<29x16xbf16>
    %c0_20 = arith.constant 0 : index
    %c48 = arith.constant 48 : index
    %17 = vector.load %arg7[%c0_20, %c48] : memref<32x80xbf16, #tpu.memory_space<vmem>>, vector<29x16xbf16>
    tpu.vector_store %arg7[%c0_20, %c48], %16 {strides = array<i32>} : memref<32x80xbf16, #tpu.memory_space<vmem>>, vector<29x16xbf16>,
    %c0_21 = arith.constant 0 : index
    %c0_22 = arith.constant 0 : index
    %c0_23 = arith.constant 0 : index
    %18 = vector.load %arg1[%c0_21, %c0_22, %c0_23] : memref<1x32x16xbf16, #tpu.memory_space<vmem>>, vector<1x3x16xbf16>
    %19 = vector.shape_cast %18 : vector<1x3x16xbf16> to vector<3x16xbf16>
    %c29 = arith.constant 29 : index
    %c48_24 = arith.constant 48 : index
    %20 = vector.load %arg7[%c29, %c48_24] : memref<32x80xbf16, #tpu.memory_space<vmem>>, vector<3x16xbf16>
    tpu.vector_store %arg7[%c29, %c48_24], %19 {strides = array<i32>} : memref<32x80xbf16, #tpu.memory_space<vmem>>, vector<3x16xbf16>,
    %c0_25 = arith.constant 0 : index
    %c4 = arith.constant 4 : index
    %c0_26 = arith.constant 0 : index
    %21 = vector.load %arg1[%c0_25, %c4, %c0_26] : memref<1x32x16xbf16, #tpu.memory_space<vmem>>, vector<1x28x16xbf16>
    %22 = vector.shape_cast %21 : vector<1x28x16xbf16> to vector<28x16xbf16>
    %c0_27 = arith.constant 0 : index
    %c64 = arith.constant 64 : index
    %23 = vector.load %arg7[%c0_27, %c64] : memref<32x80xbf16, #tpu.memory_space<vmem>>, vector<28x16xbf16>
    tpu.vector_store %arg7[%c0_27, %c64], %22 {strides = array<i32>} : memref<32x80xbf16, #tpu.memory_space<vmem>>, vector<28x16xbf16>,
    %c0_28 = arith.constant 0 : index
    %c0_29 = arith.constant 0 : index
    %c0_30 = arith.constant 0 : index
    %24 = vector.load %arg1[%c0_28, %c0_29, %c0_30] : memref<1x32x16xbf16, #tpu.memory_space<vmem>>, vector<1x4x16xbf16>
    %25 = vector.shape_cast %24 : vector<1x4x16xbf16> to vector<4x16xbf16>
    %c28 = arith.constant 28 : index
    %c64_31 = arith.constant 64 : index
    %26 = vector.load %arg7[%c28, %c64_31] : memref<32x80xbf16, #tpu.memory_space<vmem>>, vector<4x16xbf16>
    tpu.vector_store %arg7[%c28, %c64_31], %25 {strides = array<i32>} : memref<32x80xbf16, #tpu.memory_space<vmem>>, vector<4x16xbf16>,
    %c0_32 = arith.constant 0 : index
    %c0_33 = arith.constant 0 : index
    %27 = vector.load %arg7[%c0_32, %c0_33] : memref<32x80xbf16, #tpu.memory_space<vmem>>, vector<32x80xbf16>
    %c0_34 = arith.constant 0 : index
    %c0_35 = arith.constant 0 : index
    %28 = vector.load %arg2[%c0_34, %c0_35] : memref<80x128xbf16, #tpu.memory_space<vmem>>, vector<80x128xbf16>
    %cst = arith.constant dense<0.000000e+00> : vector<32x128xf32>
    %29 = tpu.matmul %27, %28, %cst {dimension_numbers = #tpu.dot_dimension_numbers<[1], [0], [0], [1], [0, 0, 1, 1], [], []>} : vector<32x80xbf16>, vector<80x128xbf16>, vector<32x128xf32> -> vector<32x128xf32>
    %30 = vector.shape_cast %29 : vector<32x128xf32> to vector<2x16x128xf32>
    %c0_36 = arith.constant 0 : index
    %c0_37 = arith.constant 0 : index
    %31 = vector.load %arg3[%c0_36, %c0_37] : memref<16x128xf32, #tpu.memory_space<vmem>>, vector<16x128xf32>
    %32 = vector.shape_cast %31 : vector<16x128xf32> to vector<1x16x128xf32>
    %33 = vector.broadcast %32 : vector<1x16x128xf32> to vector<2x16x128xf32>
    %34 = arith.addf %30, %33 : vector<2x16x128xf32>
    %cst_38 = arith.constant 0.000000e+00 : f32
    %35 = vector.broadcast %cst_38 : f32 to vector<2x16x128xf32>
    %36 = arith.maximumf %34, %35 : vector<2x16x128xf32>
    %cst_39 = arith.constant dense<0xFF800000> : vector<2x128xf32>
    %37 = vector.multi_reduction <maximumf>, %36, %cst_39 [1] : vector<2x16x128xf32> to vector<2x128xf32>
    %c0_40 = arith.constant 0 : index
    %c0_41 = arith.constant 0 : index
    %38 = vector.load %arg4[%c0_40, %c0_41] : memref<1x128xf32, #tpu.memory_space<vmem>>, vector<1x128xf32>
    %cst_42 = arith.constant dense<0.000000e+00> : vector<1x2xf32>
    %39 = tpu.matmul %38, %37, %cst_42 {dimension_numbers = #tpu.dot_dimension_numbers<[1], [1], [0], [0], [0, 0, 1, 0], [], []>} : vector<1x128xf32>, vector<2x128xf32>, vector<1x2xf32> -> vector<1x2xf32>
    %c0_43 = arith.constant 0 : index
    %c0_44 = arith.constant 0 : index
    %40 = vector.load %arg5[%c0_43, %c0_44] : memref<1x1xf32, #tpu.memory_space<vmem>>, vector<1x1xf32>
    %41 = vector.broadcast %40 : vector<1x1xf32> to vector<1x2xf32>
    %42 = arith.addf %39, %41 : vector<1x2xf32>
    %c0_45 = arith.constant 0 : index
    %c0_46 = arith.constant 0 : index
    %c0_47 = arith.constant 0 : index
    %43 = vector.load %arg6[%c0_45, %c0_46, %c0_47] : memref<1x1x2xf32, #tpu.memory_space<vmem>>, vector<1x1x2xf32>
    %44 = vector.shape_cast %43 : vector<1x1x2xf32> to vector<1x2xf32>
    %45 = vector.shape_cast %42 : vector<1x2xf32> to vector<1x1x2xf32>
    tpu.vector_store %arg6[%c0_45, %c0_46, %c0_47], %45 {strides = array<i32>} : memref<1x1x2xf32, #tpu.memory_space<vmem>>, vector<1x1x2xf32>,
    return
  }
  func.func @transform_0(%arg0: i32) -> (i32, i32, i32) {
    %c0_i32 = arith.constant 0 : i32
    %c0_i32_0 = arith.constant 0 : i32
    %c0_i32_1 = arith.constant 0 : i32
    return %arg0, %c0_i32, %c0_i32_0 : i32, i32, i32
  }
  func.func @transform_1(%arg0: i32) -> (i32, i32) {
    %c0_i32 = arith.constant 0 : i32
    %c0_i32_0 = arith.constant 0 : i32
    %c0_i32_1 = arith.constant 0 : i32
    return %c0_i32, %c0_i32_0 : i32, i32
  }
  func.func @transform_2(%arg0: i32) -> (i32, i32) {
    %c0_i32 = arith.constant 0 : i32
    %c0_i32_0 = arith.constant 0 : i32
    %c0_i32_1 = arith.constant 0 : i32
    return %c0_i32, %c0_i32_0 : i32, i32
  }
  func.func @transform_3(%arg0: i32) -> (i32, i32) {
    %c0_i32 = arith.constant 0 : i32
    %c0_i32_0 = arith.constant 0 : i32
    %c0_i32_1 = arith.constant 0 : i32
    return %c0_i32, %c0_i32_0 : i32, i32
  }
  func.func @transform_4(%arg0: i32) -> (i32, i32) {
    %c0_i32 = arith.constant 0 : i32
    %c0_i32_0 = arith.constant 0 : i32
    %c0_i32_1 = arith.constant 0 : i32
    return %c0_i32, %c0_i32_0 : i32, i32
  }
  func.func @transform_5(%arg0: i32) -> (i32, i32, i32) {
    %c0_i32 = arith.constant 0 : i32
    %c0_i32_0 = arith.constant 0 : i32
    %c0_i32_1 = arith.constant 0 : i32
    return %arg0, %c0_i32, %c0_i32_0 : i32, i32, i32
  }
}

</mosaic_0001>

<bundles_post_ra>
// kernel: cnn_base_model_forward.1
= control target key start
LH: loop header
LB: loop body
LE: loop exit
PB: predicated region body
PF: predicated region fallthrough
CT: control target
= control target key end

     0   :  { %s796_s20 = smov 0   ;;  %s975_s0 = inlined_call_operand.vmem [shape: bf16[2,32,16], index: 0, kind: input, shape index: {}]   ;;  %s976_s1 = inlined_call_operand.vmem [shape: bf16[80,128], index: 1, kind: input, shape index: {}]   ;;  %s977_s2 = inlined_call_operand.vmem [shape: f32[16,128], index: 2, kind: input, shape index: {}]   ;;  %s978_s3 = inlined_call_operand.vmem [shape: f32[1,128], index: 3, kind: input, shape index: {}]   ;;  %s979_s4 = inlined_call_operand.<no memory space> [shape: f32[1,1], index: 4, kind: input, shape index: {}]   ;;  %s980_s5 = inlined_call_operand.vmem [shape: f32[2,1,2], index: 5, kind: output, shape index: {}]  }
   0x1   :  { %v10_v0 = vstv %s979_s4 }
   0x2   :  { %11 = vst [vmem:[#allocation3] sm:$0x1] %v10_v0 }
   0x3 LB: > { %s681_s21 = sadd.s32 4294967295, %s756_s20   ;;  %p685_p0 = scmp.ge.s32.totalorder %s756_s20, 1  ;;  %s756_s20 = sphi %s796_s20, %s17_s20  }
   0x4   : > { %p189_p1 = scmp.lt.s32.totalorder %s756_s20, 3 }
   0x6   : > { %p190_p2 = pnand %p685_p0, %p189_p1 }
   0x7   : > { %p215_p3 = scmp.lt.s32.totalorder (!%p190_p2), %s681_s21, 1  ;;  %s758_s25 = smov (!%p190_p2), 32  }
   0x8   : > { %193 = sbr.rel (%p190_p2) target bundleno = 478 (0x1de), region = 40  ;;  %s759_s26 = smov (!%p190_p2), 16  }
   0x9   : > { %s760_s27 = smov (!%p190_p2), 48   ;;  %s761_s28 = smov (!%p190_p2), 64  }
   0xd   : > { %s990_s21 = smov (!%p215_p3, %s681_s21), 1  ;;  %vm322_vm0 = vcmask 1042432   ;;  %vm323_vm1 = vcmask 1046532   ;;  %vm237_vm2 = vsmask.f32 3328  ;;  %vm455_vm6 = vcmask 1041408  }
   0xe   : > { %s722_s4 = sshll.u32 %s990_s21, 4  ;;  %vm238_vm3 = vsmask.f32 7440  ;;  %vm846_vm4 = vmor %vm322_vm0, %vm323_vm1  ;;  %vm456_vm7 = vcmask 1045508   ;;  %vm366_vm8 = vsmask.f32 2304  ;;  %s222_s23 = scalar_lea.vmem %s980_s5, %s990_s21 }
   0xf   : > { %s810_s24 = scalar_lea.vmem %s975_s0, %s722_s4  ;;  %vm853_vm5 = vmor %vm237_vm2, %vm238_vm3  ;;  %vm367_vm9 = vsmask.f32 6416  ;;  %vm228_vm12 = vcmask 125952   ;;  %vm291_vm13 = vcmask 257152   ;;  %vm352_vm15 = vcmask 387328  }
  0x10   : > { %v813_v1 = vld [vmem:[%s810_s24 + $0xc] sm:$0xf]  ;;  %v300_v2 = vld [vmem:[%s810_s24] sm:$0x1]  ;;  %v826_v22 = vld [vmem:[%s810_s24 + $0x8] sm:$0xf] }
  0x11   : > { %v365_v3 = vld [vmem:[%s810_s24 + $0xc] sm:$0xf]  ;;  %v333_v4 = vrot.slane %v813_v1, 5  ;;  %v302_v5 = vshll.u32 %v300_v2, 16  ;;  %v429_v18 = vld [vmem:[%s810_s24] sm:$0x3]  ;;  %vm867_vm10 = vmor %vm455_vm6, %vm456_vm7 }
  0x12   : > { %v399_v6 = vshrl.u32 %v365_v3, 16  ;;  %v402_v7 = vshll.u32 %v365_v3, 16  ;;  %v236_v8 = vld [vmem:[%s810_s24 + $0xc] sm:$0xf]  ;;  %v354_v19 = vld [vmem:[%s810_s24] sm:$0x1]  ;;  %vm873_vm11 = vmor %vm366_vm8, %vm367_vm9 }
  0x13   : > { %v270_v9 = vshll.u32 %v236_v8, 16  ;;  %v274_v10 = vshrl.u32 %v236_v8, 16  ;;  %v335_v11 = vrot.slane %v333_v4, 4  ;;  %v304_v12 = vrot.slane %v302_v5, 5  ;;  %v235_v23 = vld [vmem:[%s810_s24 + $0x8] sm:$0xf]  ;;  %vm296_vm14 = vmand %vm291_vm13, %vm237_vm2 }
  0x14   : > { %v401_v13 = vrot.slane %v399_v6, 5  ;;  %v404_v14 = vrot.slane %v402_v7, 6  ;;  %v356_v21 = vrot.slane %v354_v19, 5  ;;  %v431_v24 = vshrl.u32 %v429_v18, 16  ;;  %v835_v33 = vld [vmem:[%s810_s24 + $0x8] sm:$0xf] }
  0x15   : > { %v272_v15 = vrot.slane %v270_v9, 5  ;;  %v276_v16 = vrot.slane %v274_v10, 4  ;;  %342 = vrot.lane.b32.xlu0 %v335_v11, %s758_s25  ;;  %305 = vrot.lane.b32.xlu1 %v304_v12, %s759_s26  ;;  %v434_v25 = vshll.u32 %v429_v18, 16  ;;  %v260_v28 = vshll.u32 %v235_v23, 16  ;;  %v234_v36 = vld [vmem:[%s810_s24 + $0x4] sm:$0xf] }
  0x16   : > { %v821_v17 = vor.u32 %v404_v14, %v401_v13  ;;  %357 = vrot.lane.b32.xlu2 %v356_v21, %s758_s25  ;;  %v264_v29 = vshrl.u32 %v235_v23, 16  ;;  %v330_v30 = vrot.slane %v826_v22, 5  ;;  %v433_v34 = vrot.slane %v431_v24, 5  ;;  %v364_v38 = vld [vmem:[%s810_s24 + $0x8] sm:$0xf] }
  0x17   : > { %v277_v20 = vor.u32 %v276_v16, %v272_v15  ;;  %v832_v31 = vrot.slane %v260_v28, 5  ;;  %v436_v35 = vrot.slane %v434_v25, 6  ;;  %v233_v41 = vld [vmem:[%s810_s24] sm:$0xf]  ;;  %v463_v43 = vrot.slane %v835_v33, 6 }
  0x18   : > { %v407_v26 = vrot.slane %v821_v17, 4  ;;  %v266_v32 = vrot.slane %v264_v29, 4  ;;  %v332_v39 = vrot.slane %v330_v30, 4  ;;  %v250_v45 = vshll.u32 %v234_v36, 16  ;;  %v450_v48 = vld [vmem:[%s810_s24 + $0xc] sm:$0xf] }
  0x19   : > { %v278_v27 = vrot.slane %v277_v20, 4  ;;  %v389_v46 = vshrl.u32 %v364_v38, 16  ;;  %v437_v47 = vor.u32 %v436_v35, %v433_v34  ;;  %v254_v49 = vshrl.u32 %v234_v36, 16  ;;  %v362_v1 = vld [vmem:[%s810_s24] sm:$0xe] }
  0x1a   : > { %v267_v37 = vor.u32 %v266_v32, %v832_v31  ;;  %v392_v51 = vshll.u32 %v364_v38, 16  ;;  %v334_v52 = vsel %vm846_vm4, %v332_v39, %v333_v4  ;;  %v241_v53 = vshrl.u32 %v233_v41, 16  ;;  %v363_v9 = vld [vmem:[%s810_s24 + $0x4] sm:$0xf]  ;;  %v487_v12 = vld [vmem:[%s810_s24] sm:$0x3] }
  0x1b   : > { %v244_v54 = vshll.u32 %v233_v41, 16  ;;  %v391_v55 = vrot.slane %v389_v46, 5  ;;  %v466_v57 = vrot.slane %v450_v48, 6  ;;  %v252_v58 = vrot.slane %v250_v45, 5  ;;  %v315_v20 = vld [vmem:[%s810_s24 + $0x4] sm:$0xf] }
  0x1c   : > { %v268_v42 = vrot.slane %v267_v37, 4  ;;  %v394_v56 = vrot.slane %v392_v51, 6  ;;  %v256_v59 = vrot.slane %v254_v49, 4  ;;  %v465_v61 = vrot.slane %v463_v43, 4  ;;  %v314_v21 = vld [vmem:[%s810_s24] sm:$0xe] }
  0x1d   : > { %414 = vrot.lane.b32.xlu1 %v407_v26, %s760_s27  ;;  %285 = vrot.lane.b32.xlu0 %v278_v27, %s759_s26  ;;  %v243_v62 = vrot.slane %v241_v53, 4  ;;  %v246_v63 = vrot.slane %v244_v54, 5  ;;  %v468_v4 = vrot.slane %v466_v57, 4  ;;  %v370_v10 = vshrl.u32 %v362_v1, 16  ;;  %v448_v36 = vld [vmem:[%s810_s24 + $0x4] sm:$0xf] }
  0x1e   : > { %v273_v50 = vsel %vm853_vm5, %v268_v42, %v272_v15  ;;  %v395_v60 = vor.u32 %v394_v56, %v391_v55  ;;  %v257_v5 = vor.u32 %v256_v59, %v252_v58  ;;  %v467_v7 = vsel %vm867_vm10, %v465_v61, %v466_v57  ;;  %v447_v41 = vld [vmem:[%s810_s24] sm:$0xc]  ;;  %v227_v40 = vld [vmem:[%s810_s24 + $0xc] sm:$0xf]  ;;  %v226_v48 = vld [vmem:[%s810_s24 + $0x8] sm:$0xf] }
  0x1f   : > { %283 = vrot.lane.b32.xlu2 %v273_v50, %s759_s26  ;;  %v247_v8 = vor.u32 %v246_v63, %v243_v62  ;;  %v373_v11 = vshll.u32 %v362_v1, 16  ;;  %v379_v14 = vshrl.u32 %v363_v9, 16  ;;  %v382_v15 = vshll.u32 %v363_v9, 16  ;;  %232 = vst.msk [vmem:[#allocation2 + $0xc] sm:$0xf] %vm228_vm12, %v227_v40  ;;  %v729_v33 = vld [vmem:[%s976_s1 + $0x20] sm:$0xff] }
  0x20   : > { %v397_v2 = vrot.slane %v395_v60, 4  ;;  %v258_v13 = vrot.slane %v257_v5, 4  ;;  %v489_v19 = vrot.slane %v487_v12, 6  ;;  %v327_v28 = vrot.slane %v315_v20, 5  ;;  %231 = vst.msk [vmem:[#allocation2 + $0x8] sm:$0xf] %vm228_vm12, %v226_v48  ;;  %730 = vmatpush.bf16.msra.mxu2 %v729_v33  ;;  %559 = vmatpush.bf16.msra.mxu0 %v729_v33 }
  0x21   : > { %v248_v16 = vrot.slane %v247_v8, 4  ;;  %v375_v18 = vrot.slane %v373_v11, 6  ;;  %v381_v23 = vrot.slane %v379_v14, 5  ;;  %v384_v24 = vrot.slane %v382_v15, 6  ;;  %v728_v49 = vld [vmem:[%s976_s1 + $0x18] sm:$0xff]  ;;  %v727_v50 = vld [vmem:[%s976_s1 + $0x10] sm:$0xff] }
  0x22   : > { %v406_v6 = vsel %vm873_vm11, %v397_v2, %v821_v17  ;;  %v372_v17 = vrot.slane %v370_v10, 5  ;;  %v263_v25 = vsel %vm853_vm5, %v258_v13, %v832_v31  ;;  %v688_v29 = vrot.slane %v314_v21, 9  ;;  %v726_v51 = vld [vmem:[%s976_s1 + $0x8] sm:$0xff]  ;;  %v225_v54 = vld [vmem:[%s810_s24 + $0x4] sm:$0xf] }
  0x23   : > { %v253_v26 = vsel %vm853_vm5, %v248_v16, %v252_v58  ;;  %v385_v34 = vor.u32 %v384_v24, %v381_v23  ;;  %v329_v35 = vrot.slane %v327_v28, 4  ;;  %v460_v39 = vrot.slane %v448_v36, 6  ;;  %v224_v55 = vld [vmem:[%s810_s24] sm:$0xf]  ;;  %230 = vst.msk [vmem:[#allocation2 + $0x4] sm:$0xf] %vm228_vm12, %v225_v54 }
  0x24   : > { %v376_v27 = vor.u32 %v375_v18, %v372_v17  ;;  %v328_v31 = vsel %vm846_vm4, %v688_v29, %v327_v28  ;;  %v689_v45 = vrot.slane %v447_v41, 10  ;;  %731 = vmatpush.bf16.msra.mxu2 %v728_v49  ;;  %560 = vmatpush.bf16.msra.mxu0 %v728_v49  ;;  %229 = vst.msk [vmem:[#allocation2] sm:$0xf] %vm228_vm12, %v224_v55  ;;  %v725_v56 = vld [vmem:[%s976_s1] sm:$0xff]  ;;  %vm308_vm0 = vcmask 257155   ;;  %v576_v21 = vld [vmem:[%s977_s2 + $0x8] sm:$0xff] }
  0x25   : > { %438 = vrot.lane.b32.xlu1 %v437_v47, %s760_s27  ;;  %340 = vrot.lane.b32.xlu0 %v334_v52, %s758_s25  ;;  %v331_v38 = vsel %vm846_vm4, %v329_v35, %v330_v30  ;;  %v387_v42 = vrot.slane %v385_v34, 4  ;;  %v462_v44 = vrot.slane %v460_v39, 4  ;;  %vm309_vm1 = vsmask.f32 7950  ;;  %v575_v20 = vld [vmem:[%s977_s2] sm:$0xff] }
  0x26   : > { %v377_v32 = vrot.slane %v376_v27, 4  ;;  %v461_v30 = vsel %vm867_vm10, %v689_v45, %v460_v39  ;;  %v297_v57 = vld [vmem:[#allocation2 + $0xc] sm:$0xf]  ;;  %vm424_vm3 = vcmask 518528   ;;  %vm348_vm4 = vcmask 388352   ;;  %vm310_vm5 = vmand %vm308_vm0, %vm309_vm1 }
  0x27   : > { %412 = vrot.lane.b32.xlu2 %v406_v6, %s760_s27  ;;  %v396_v46 = vsel %vm873_vm11, %v387_v42, %v395_v60  ;;  %v464_v22 = vsel %vm867_vm10, %v462_v44, %v463_v43  ;;  %vm420_vm6 = vcmask 519552   ;;  %vm425_vm7 = vmand %vm424_vm3, %vm366_vm8  ;;  %vm360_vm9 = vcmask 388355   ;;  %v600_v28 = vld [vmem:[#allocation3] sm:$0x1] }
  0x28   : > { %v386_v37 = vsel %vm873_vm11, %v377_v32, %v385_v34  ;;  %732 = vmatpush.bf16.msra.mxu2 %v727_v50  ;;  %561 = vmatpush.bf16.msra.mxu0 %v727_v50  ;;  %vm485_vm2 = vcmask 648704   ;;  %vm441_vm10 = vcmask 519554   ;;  %vm442_vm11 = vsmask.f32 7946  ;;  %v599_v50 = vld [vmem:[%s978_s3] sm:$0x1] }
  0x29   : > { %vm481_vm12 = vcmask 650752   ;;  %vm443_vm8 = vmand %vm441_vm10, %vm442_vm11  ;;  %v762_v32 = vmov 0   ;;  %vm632_vm0 = vcmask 8192  }
  0x2a   : > { %748 = vset.pattern.permute.xlu2 %v762_v32  ;;  %749 = vset.pattern.permute.xlu0 %v762_v32 }
  0x2c   : > { %733 = vmatpush.bf16.msra.mxu2 %v726_v51  ;;  %562 = vmatpush.bf16.msra.mxu0 %v726_v51 }
  0x2d   : > { %475 = vrot.lane.b32.xlu1 %v468_v4, %s761_s28  ;;  %473 = vrot.lane.b32.xlu0 %v467_v7, %s761_s28 }
  0x2f   : > { %490 = vrot.lane.b32.xlu2 %v489_v19, %s761_s28 }
  0x30   : > { %734 = vmatpush.bf16.msra.mxu2 %v725_v56  ;;  %563 = vmatpush.bf16.msra.mxu0 %v725_v56 }
  0x35   : > { %281 = vrot.lane.b32.xlu1 %v263_v25, %s759_s26  ;;  %279 = vrot.lane.b32.xlu0 %v253_v26, %s759_s26 }
  0x37   : > { %336 = vrot.lane.b32.xlu2 %v328_v31, %s758_s25 }
  0x3d   : > { %408 = vrot.lane.b32.xlu1 %v386_v37, %s760_s27  ;;  %338 = vrot.lane.b32.xlu0 %v331_v38, %s758_s25 }
  0x3f   : > { %410 = vrot.lane.b32.xlu2 %v396_v46, %s760_s27 }
  0x45   : > { %471 = vrot.lane.b32.xlu1 %v464_v22, %s761_s28  ;;  %469 = vrot.lane.b32.xlu0 %v461_v30, %s761_s28 }
  0x47   : > { %603 = vperm.xlu2 %748, %v600_v28  }
  0x70   : > { %v358_v47 = vpop.permute.xlu2 %357 }
  0x79   : > { %v284_v43 = vpop.permute.xlu2 %283 }
  0x7a   : > { %294 = vst.msk [vmem:[#allocation2 + $0x8] sm:$0xf] %vm291_vm13, %v284_v43 }
  0x81   : > { %v413_v61 = vpop.permute.xlu2 %412 }
  0x87   : > { %v343_v52 = vpop.permute.xlu0 %342  ;;  %v306_v53 = vpop.permute.xlu1 %305 }
  0x89   : > { %v491_v4 = vpop.permute.xlu2 %490 }
  0x8f   : > { %v415_v58 = vpop.permute.xlu1 %414  ;;  %v286_v59 = vpop.permute.xlu0 %285 }
  0x90   : > { %v298_v60 = vsel %vm296_vm14, %v286_v59, %v297_v57  ;;  %vm493_vm14 = vcmask 650754  }
  0x91   : > { %299 = vst [vmem:[#allocation2 + $0xc] sm:$0xf] %v298_v60  ;;  %v337_v9 = vpop.permute.xlu2 %336 }
  0x92   : > { %353 = vst.msk [vmem:[#allocation2 + $0xc] sm:$0x7] %vm352_vm15, %v343_v52  ;;  %vm549_vm15 = vcmask 654336  }
  0x97   : > { %v439_v62 = vpop.permute.xlu1 %438  ;;  %v341_v63 = vpop.permute.xlu0 %340 }
  0x98   : > { %v311_v0 = vld [vmem:[#allocation2 + $0xc] sm:$0x8]  ;;  %351 = vst.msk [vmem:[#allocation2 + $0x8] sm:$0xf] %vm348_vm4, %v341_v63 }
  0x99   : > { %v312_v1 = vsel %vm310_vm5, %v306_v53, %v311_v0  ;;  %v426_v2 = vld [vmem:[#allocation2 + $0xc] sm:$0x7]  ;;  %423 = vst.msk [vmem:[#allocation2 + $0x8] sm:$0xf] %vm420_vm6, %v413_v61  ;;  %v411_v13 = vpop.permute.xlu2 %410 }
  0x9a   : > { %313 = vst [vmem:[#allocation2 + $0xc] sm:$0x8] %v312_v1  ;;  %v427_v3 = vsel %vm425_vm7, %v415_v58, %v426_v2 }
  0x9b   : > { %361 = vst.msk [vmem:[#allocation2 + $0xc] sm:$0x8] %vm360_vm9, %v358_v47 }
  0x9c   : > { %428 = vst [vmem:[#allocation2 + $0xc] sm:$0x7] %v427_v3 }
  0x9f   : > { %v476_v5 = vpop.permute.xlu1 %475  ;;  %v474_v6 = vpop.permute.xlu0 %473 }
  0xa0   : > { %486 = vst.msk [vmem:[#allocation2 + $0xc] sm:$0x3] %vm485_vm2, %v476_v5 }
  0xa1   : > { %484 = vst.msk [vmem:[#allocation2 + $0x8] sm:$0xf] %vm481_vm12, %v474_v6  ;;  %v604_v51 = vpop.permute.xlu2 %603 }
  0xa2   : > { %v606_v52 = vperm.slane %v604_v51, 0 }
  0xa3   : > { %v444_v7 = vld [vmem:[#allocation2 + $0xc] sm:$0xc] }
  0xa4   : > { %v445_v8 = vsel %vm443_vm8, %v439_v62, %v444_v7 }
  0xa5   : > { %446 = vst [vmem:[#allocation2 + $0xc] sm:$0xc] %v445_v8 }
  0xa6   : > { %494 = vst.msk [vmem:[#allocation2 + $0xc] sm:$0xc] %vm493_vm14, %v491_v4 }
  0xa7   : > { %v282_v10 = vpop.permute.xlu1 %281  ;;  %v280_v11 = vpop.permute.xlu0 %279 }
  0xa8   : > { %293 = vst.msk [vmem:[#allocation2 + $0x4] sm:$0xf] %vm291_vm13, %v282_v10 }
  0xa9   : > { %292 = vst.msk [vmem:[#allocation2] sm:$0xf] %vm291_vm13, %v280_v11  ;;  %vm609_vm13 = vcmask 1041409  }
  0xaa   : > { %349 = vst.msk [vmem:[#allocation2] sm:$0xf] %vm348_vm4, %v337_v9 }
  0xad   : > { %v724_v12 = vld [vmem:[#allocation2 + $0x8] sm:$0xff] }
  0xae   : > { %719 = vmatmul.msk.bf16.vlgmr.msra.gmra.mxu2 %vm549_vm15, %v724_v12 }
  0xaf   : > { %v409_v14 = vpop.permute.xlu1 %408  ;;  %v339_v15 = vpop.permute.xlu0 %338 }
  0xb0   : > { %421 = vst.msk [vmem:[#allocation2] sm:$0xf] %vm420_vm6, %v409_v14 }
  0xb1   : > { %350 = vst.msk [vmem:[#allocation2 + $0x4] sm:$0xf] %vm348_vm4, %v339_v15 }
  0xb2   : > { %422 = vst.msk [vmem:[#allocation2 + $0x4] sm:$0xf] %vm420_vm6, %v411_v13 }
  0xb7   : > { %v472_v16 = vpop.permute.xlu1 %471  ;;  %v470_v17 = vpop.permute.xlu0 %469 }
  0xb8   : > { %483 = vst.msk [vmem:[#allocation2 + $0x4] sm:$0xf] %vm481_vm12, %v472_v16 }
  0xb9   : > { %482 = vst.msk [vmem:[#allocation2] sm:$0xf] %vm481_vm12, %v470_v17 }
  0xc0   : > { %v723_v18 = vld [vmem:[#allocation2] sm:$0xff] }
  0xc1   : > { %718 = vmatmul.msk.bf16.vlgmr.msra.gmra.mxu0 %vm549_vm15, %v723_v18 }
 0x131   : > { %v570_v19 = vpop.f32.mrf.mxu2 }
 0x132   : > { %v579_v23 = vadd.f32 %v575_v20, %v570_v19 }
 0x134   : > { %v583_v27 = vmax.f32 %v579_v23, 0.0 }
 0x139   : > { %v572_v24 = vpop.f32.mrf.mxu2 }
 0x13a   : > { %v580_v25 = vadd.f32 %v576_v21, %v572_v24 }
 0x13c   : > { %v584_v26 = vmax.f32 %v580_v25, 0.0 }
 0x13e   : > { %v565_v29 = vpop.f32.mrf.mxu0  ;;  %v592_v34 = vmax.f32 %v583_v27, %v584_v26 }
 0x13f   : > { %v577_v36 = vadd.f32 %v575_v20, %v565_v29 }
 0x140   : > { %v593_v35 = vrot.slane %v592_v34, 4 }
 0x141   : > { %v581_v39 = vmax.f32 %v577_v36, 0.0 }
 0x142   : > { %v594_v37 = vmax.f32 %v592_v34, %v593_v35 }
 0x144   : > { %v595_v42 = vrot.slane %v594_v37, 2 }
 0x146   : > { %v567_v31 = vpop.f32.mrf.mxu0  ;;  %v596_v22 = vmax.f32 %v594_v37, %v595_v42 }
 0x147   : > { %v578_v38 = vadd.f32 %v576_v21, %v567_v31 }
 0x148   : > { %v597_v47 = vrot.slane %v596_v22, 1 }
 0x149   : > { %v582_v41 = vmax.f32 %v578_v38, 0.0 }
 0x14a   : > { %v598_v43 = vmax.f32 %v596_v22, %v597_v47 }
 0x14b   : > { %v585_v44 = vmax.f32 %v581_v39, %v582_v41 }
 0x14d   : > { %v586_v45 = vrot.slane %v585_v44, 4 }
 0x14f   : > { %v587_v46 = vmax.f32 %v585_v44, %v586_v45 }
 0x151   : > { %v588_v30 = vrot.slane %v587_v46, 2 }
 0x153   : > { %v589_v40 = vmax.f32 %v587_v46, %v588_v30 }
 0x155   : > { %v590_v48 = vrot.slane %v589_v40, 1 }
 0x157   : > { %v591_v33 = vmax.f32 %v589_v40, %v590_v48 }
 0x159   : > { %v610_v49 = vsel %vm609_vm13, %v598_v43, %v591_v33 }
 0x15a   : > { %627 = vmatpush.xpose.msra.mxu1 %v610_v49 }
 0x15d   : > { %628 = vmatmul.f32.vlgmr.msra.gmra.mxu1 %v599_v50 }
 0x1da   : > { %v629_v53 = vpop.f32.mrf.mxu1 }
 0x1db   : > { %v630_v54 = vadd.f32 %v629_v53, %v606_v52 }
 0x1dd   : > { %633 = vst.msk [vmem:[%s222_s23] sm:$0x1] %vm632_vm0, %v630_v54 }
 0x1de PF: > { %s17_s20 = sadd.s32 1, %s756_s20  }
 0x1df   : > { %p14_p4 = scmp.ge.s32.totalorder %s17_s20, 4  }
 0x1e1   :  { %16 = sbr.rel (!%p14_p4) target bundleno = 3 (0x3), region = 70 }

</bundles_post_ra>
